<compile_context>
chip_gen: v6e
topology: v6e:2x2x1
jax: 0.10.0
libtpu: 0.0.40
codegen_flags: <defaults>
</compile_context>

<pallas_src>
import jax
import jax.numpy as jnp
from jax.experimental import pallas as pl
from jax.experimental.pallas import tpu as pltpu

BN_EPS = 1e-5
_LANE = 128
_VMEM_LIMIT_BYTES = 32 * 1024 * 1024   # scoped-VMEM budget; safe on v5e/v6e/v7x
_MAX_BLOCK_BYTES = 8 * 1024 * 1024     # per-block cap; x2 for double buffering


def _round_up(x, m):
    return -(-x // m) * m


def _pick_lane_tile(hw, bytes_per_lane_col, max_block_bytes, max_lanes):
    """Lane-tile (last-dim block) for streaming a length-hw axis, unpadded."""
    if hw <= _LANE:
        return hw                              # single full-extent tile
    budget = (max_block_bytes // max(bytes_per_lane_col, 1)) // _LANE * _LANE
    budget = max(budget, _LANE)
    cap = max(_LANE, (max_lanes // _LANE) * _LANE)
    t = max(_LANE, min(budget, cap, _round_up(hw, _LANE)))
    # If one block covers everything, take the exact extent (no masking needed).
    return hw if t >= hw else t


def _pick_cin_tile(n, cin, itemsize, t_hw, max_block_bytes):
    """Largest divisor of cin (sublane-aligned) whose x block fits the budget."""
    per_c_bytes = n * t_hw * itemsize
    if cin * per_c_bytes <= max_block_bytes:
        return cin
    min_c = max(8, 32 // max(itemsize, 1))     # 8 for f32, 16 for bf16
    divisors = [c for c in range(min_c, cin, min_c) if cin % c == 0]
    if not divisors:
        return cin                             # cannot split cleanly
    fitting = [c for c in divisors if c * per_c_bytes <= max_block_bytes]
    return max(fitting) if fitting else min(divisors)


# --------------------------- Phase 1: pool + conv + BN ---------------------------
def _make_pool_conv_bn_kernel(hw, t_hw, num_c):
    ragged = (hw % t_hw) != 0

    def kernel(x_ref, w_ref, gamma_ref, beta_ref, y_ref, acc_ref):
        # x_ref:     (N, c_tile, t_hw)      current (Cin-block, HW-tile)
        # w_ref:     (num_c, c_tile, Cout)  conv weight, pre-transposed, /HW folded in
        # gamma_ref: (1, Cout), beta_ref: (1, Cout)
        # y_ref:     (N, Cout, 1)           pooled + conv + BN result
        # acc_ref:   (num_c, N, c_tile)     raw-sum accumulators (VMEM scratch)
        ci = pl.program_id(0)
        hi = pl.program_id(1)

        @pl.when((ci == 0) & (hi == 0))
        def _():
            acc_ref[...] = jnp.zeros_like(acc_ref)

        x = x_ref[...].astype(jnp.float32)
        if ragged:
            # Zero the out-of-range lanes of the last (partial) HW tile.
            valid = hw - hi * t_hw
            lane = jax.lax.broadcasted_iota(jnp.int32, x.shape, 2)
            x = jnp.where(lane < valid, x, 0.0)
        acc_ref[ci] += jnp.sum(x, axis=-1)                       # (N, c_tile)

        @pl.when((ci == pl.num_programs(0) - 1) & (hi == pl.num_programs(1) - 1))
        def _():
            # mean-pool @ W^T  ==  raw_sum @ (W^T / HW); combine Cin blocks.
            y = jnp.dot(acc_ref[0], w_ref[0], preferred_element_type=jnp.float32)
            for g in range(1, num_c):
                y = y + jnp.dot(acc_ref[g], w_ref[g],
                                preferred_element_type=jnp.float32)
            # Training-mode BatchNorm: spatially-constant values => stats over N.
            mean = jnp.mean(y, axis=0, keepdims=True)
            var = jnp.mean((y - mean) ** 2, axis=0, keepdims=True)
            y = (y - mean) * jax.lax.rsqrt(var + BN_EPS) * gamma_ref[...] + beta_ref[...]
            # Emit with Cout on sublanes so Phase 2 is a pure lane-splat.
            y_ref[...] = y[:, :, None]

    return kernel


# --------------------------- Phase 2: broadcast over HW --------------------------
def _broadcast_kernel(y_ref, o_ref):
    # y_ref: (N, Cout, 1) f32   o_ref: (N, Cout, t_hw) lane-dense store tile
    o_ref[...] = jnp.broadcast_to(y_ref[...], o_ref.shape).astype(o_ref.dtype)


def image_pooling(x_nchw, conv_w, gamma, beta, *, out_dtype=None,
                  max_hw_tile=4096, max_block_bytes=_MAX_BLOCK_BYTES):
    """x_nchw: (N, Cin, H, W); conv_w: (Cout, Cin) or (Cout, Cin, 1, 1);
    gamma/beta: (Cout,). Output dtype defaults to x's dtype."""
    N, Cin, H, W = x_nchw.shape
    conv_w = jnp.asarray(conv_w)
    if conv_w.ndim == 4:
        conv_w = conv_w[:, :, 0, 0]
    Cout = conv_w.shape[0]
    HW = H * W
    out_dtype = x_nchw.dtype if out_dtype is None else out_dtype
    in_itemsize = jnp.dtype(x_nchw.dtype).itemsize
    out_itemsize = jnp.dtype(out_dtype).itemsize

    # Free collapse of (H, W) -> HW; NO pad, NO cast (native dtype streamed).
    x3 = x_nchw.reshape(N, Cin, HW)

    t_hw_in = _pick_lane_tile(HW, N * Cin * in_itemsize, max_block_bytes, max_hw_tile)
    c_tile = _pick_cin_tile(N, Cin, in_itemsize, t_hw_in, max_block_bytes)
    num_c = Cin // c_tile
    num_hw = pl.cdiv(HW, t_hw_in)

    # Host-side once (tiny): transpose weight, fold in 1/HW, split Cin blocks.
    w = (conv_w.astype(jnp.float32).T * (1.0 / float(HW))).reshape(num_c, c_tile, Cout)
    gamma2 = gamma.reshape(1, Cout).astype(jnp.float32)
    beta2 = beta.reshape(1, Cout).astype(jnp.float32)

    # ---- Phase 1: reduce (Cin-blocks x HW-tiles) -> (N, Cout, 1) pooled+conv+BN ----
    y = pl.pallas_call(
        _make_pool_conv_bn_kernel(HW, t_hw_in, num_c),
        out_shape=jax.ShapeDtypeStruct((N, Cout, 1), jnp.float32),
        grid_spec=pltpu.PrefetchScalarGridSpec(
            num_scalar_prefetch=0,
            grid=(num_c, num_hw),
            in_specs=[
                pl.BlockSpec((N, c_tile, t_hw_in), lambda ci, hi: (0, ci, hi)),
                pl.BlockSpec((num_c, c_tile, Cout), lambda ci, hi: (0, 0, 0)),
                pl.BlockSpec((1, Cout), lambda ci, hi: (0, 0)),
                pl.BlockSpec((1, Cout), lambda ci, hi: (0, 0)),
            ],
            out_specs=pl.BlockSpec((N, Cout, 1), lambda ci, hi: (0, 0, 0)),
            scratch_shapes=[pltpu.VMEM((num_c, N, c_tile), jnp.float32)],
        ),
        compiler_params=pltpu.CompilerParams(
            dimension_semantics=("arbitrary", "arbitrary"),   # accumulator resident
            vmem_limit_bytes=_VMEM_LIMIT_BYTES,
        ),
        cost_estimate=pl.CostEstimate(
            flops=N * Cin * HW + 2 * N * Cin * Cout,
            transcendentals=0,
            bytes_accessed=in_itemsize * N * Cin * HW + 4 * (Cin * Cout + N * Cout),
        ),
    )(x3, w, gamma2, beta2)

    # ---- Phase 2: store-only broadcast of (N, Cout, 1) over unpadded HW tiles ----
    t_hw_out = _pick_lane_tile(HW, N * Cout * out_itemsize, max_block_bytes, max_hw_tile)
    out3 = pl.pallas_call(
        _broadcast_kernel,
        out_shape=jax.ShapeDtypeStruct((N, Cout, HW), out_dtype),
        grid_spec=pltpu.PrefetchScalarGridSpec(
            num_scalar_prefetch=0,
            grid=(pl.cdiv(HW, t_hw_out),),
            in_specs=[pl.BlockSpec((N, Cout, 1), lambda i: (0, 0, 0))],
            out_specs=pl.BlockSpec((N, Cout, t_hw_out), lambda i: (0, 0, i)),
        ),
        compiler_params=pltpu.CompilerParams(
            dimension_semantics=("parallel",),                 # independent store tiles
            vmem_limit_bytes=_VMEM_LIMIT_BYTES,
        ),
        cost_estimate=pl.CostEstimate(
            flops=0,
            transcendentals=0,
            bytes_accessed=4 * N * Cout + out_itemsize * N * Cout * HW,
        ),
    )(y)

    return out3.reshape(N, Cout, H, W)


def image_pooling_ref(x, conv_w, gamma, beta):
    """Pure-JAX f32 reference matching the PyTorch forward (training-mode BN)."""
    x = x.astype(jnp.float32)
    N, Cin, H, W = x.shape
    Cout = conv_w.shape[0]
    pooled = jnp.mean(x, axis=(2, 3))                              # (N, Cin)
    yv = pooled @ conv_w.astype(jnp.float32).T                     # (N, Cout)
    up = jnp.broadcast_to(yv[:, :, None, None], (N, Cout, H, W))
    mean = jnp.mean(up, axis=(0, 2, 3), keepdims=True)
    var = jnp.mean((up - mean) ** 2, axis=(0, 2, 3), keepdims=True)
    return (up - mean) * jax.lax.rsqrt(var + BN_EPS) \
        * gamma.astype(jnp.float32)[None, :, None, None] \
        + beta.astype(jnp.float32)[None, :, None, None]


if __name__ == "__main__":
    def run_case(idx, N, Cin, Cout, H, W, dtype, atol, **kwargs):
        kx, kw_, kg, kb = jax.random.split(
            jax.random.fold_in(jax.random.PRNGKey(0), idx), 4)
        x = jax.random.normal(kx, (N, Cin, H, W), dtype=jnp.float32).astype(dtype)
        conv_w = jax.random.normal(kw_, (Cout, Cin), dtype=jnp.float32) * 0.1
        gamma = 1.0 + 0.1 * jax.random.normal(kg, (Cout,), dtype=jnp.float32)
        beta = 0.1 * jax.random.normal(kb, (Cout,), dtype=jnp.float32)

        out = jax.block_until_ready(image_pooling(x, conv_w, gamma, beta, **kwargs))
        ref = image_pooling_ref(x, conv_w, gamma, beta)
        assert out.shape == (N, Cout, H, W), (idx, out.shape)
        err = float(jnp.max(jnp.abs(out.astype(jnp.float32) - ref)))
        assert err <= atol, f"case {idx}: max err {err}"

    # 1) multi-step HW reduction + multi-tile broadcast, aligned HW, f32.
    run_case(1, 2, 4, 8, 16, 16, jnp.float32, 1e-3, max_hw_tile=128)
    # 2) forced Cin-split grid axis + ragged (non-128-multiple) HW tail masking.
    run_case(2, 2, 256, 16, 13, 13, jnp.float32, 1e-3, max_block_bytes=64 * 1024)
    # 3) bf16 input streamed natively, bf16 output, single full-extent HW tile.
    run_case(3, 2, 4, 8, 9, 9, jnp.bfloat16, 5e-2)

    print("KERNEL_OK")
</pallas_src>

<mosaic_0001>
module attributes {stable_mosaic.version = 11 : i64} {
  func.func @kernel(%arg0: i32, %arg1: i32, %arg2: memref<2x4x128xf32, #tpu.memory_space<vmem>>, %arg3: memref<1x4x8xf32, #tpu.memory_space<vmem>>, %arg4: memref<1x8xf32, #tpu.memory_space<vmem>>, %arg5: memref<1x8xf32, #tpu.memory_space<vmem>>, %arg6: memref<2x8x1xf32, #tpu.memory_space<vmem>>, %arg7: memref<1x2x4xf32, #tpu.memory_space<vmem>>) attributes {dimension_semantics = [#tpu.dimension_semantics<arbitrary>, #tpu.dimension_semantics<arbitrary>], iteration_bounds = array<i64: 1, 2>, scalar_prefetch = 0 : i64, scratch_operands = 1 : i64, tpu.core_type = #tpu.core_type<tc>, window_params = [{transform_indices = @transform_0, window_bounds = array<i64: 2, 4, 128>}, {pipeline_mode = #tpu.pipeline_mode<synchronous>, transform_indices = @transform_1, window_bounds = array<i64: 1, 4, 8>}, {pipeline_mode = #tpu.pipeline_mode<synchronous>, transform_indices = @transform_2, window_bounds = array<i64: 1, 8>}, {pipeline_mode = #tpu.pipeline_mode<synchronous>, transform_indices = @transform_3, window_bounds = array<i64: 1, 8>}, {pipeline_mode = #tpu.pipeline_mode<synchronous>, transform_indices = @transform_4, window_bounds = array<i64: 2, 8, 1>}]} {
    %c0_i32 = arith.constant 0 : i32
    %0 = arith.cmpi eq, %arg0, %c0_i32 : i32
    %c0_i32_0 = arith.constant 0 : i32
    %1 = arith.cmpi eq, %arg1, %c0_i32_0 : i32
    %2 = arith.andi %0, %1 : i1
    %3 = arith.extui %2 : i1 to i32
    %c0_i32_1 = arith.constant 0 : i32
    %4 = arith.cmpi ne, %3, %c0_i32_1 : i32
    scf.if %4 {
      %cst_10 = arith.constant 0.000000e+00 : f32
      %20 = vector.broadcast %cst_10 : f32 to vector<1x2x4xf32>
      %c0_11 = arith.constant 0 : index
      %c0_12 = arith.constant 0 : index
      %c0_13 = arith.constant 0 : index
      %21 = vector.load %arg7[%c0_11, %c0_12, %c0_13] : memref<1x2x4xf32, #tpu.memory_space<vmem>>, vector<1x2x4xf32>
      tpu.vector_store %arg7[%c0_11, %c0_12, %c0_13], %20 {strides = array<i32>} : memref<1x2x4xf32, #tpu.memory_space<vmem>>, vector<1x2x4xf32>,
    } else {
    }
    %c0 = arith.constant 0 : index
    %c0_2 = arith.constant 0 : index
    %c0_3 = arith.constant 0 : index
    %5 = vector.load %arg2[%c0, %c0_2, %c0_3] : memref<2x4x128xf32, #tpu.memory_space<vmem>>, vector<2x4x128xf32>
    %6 = arith.index_cast %arg0 : i32 to index
    %c0_4 = arith.constant 0 : index
    %c0_5 = arith.constant 0 : index
    %7 = vector.load %arg7[%6, %c0_4, %c0_5] : memref<1x2x4xf32, #tpu.memory_space<vmem>>, vector<1x2x4xf32>
    %8 = vector.shape_cast %7 : vector<1x2x4xf32> to vector<2x4xf32>
    %cst = arith.constant dense<0.000000e+00> : vector<2x4xf32>
    %9 = vector.multi_reduction <add>, %5, %cst [2] : vector<2x4x128xf32> to vector<2x4xf32>
    %10 = arith.addf %8, %9 : vector<2x4xf32>
    %11 = arith.index_cast %arg0 : i32 to index
    %c0_6 = arith.constant 0 : index
    %c0_7 = arith.constant 0 : index
    %12 = vector.load %arg7[%11, %c0_6, %c0_7] : memref<1x2x4xf32, #tpu.memory_space<vmem>>, vector<1x2x4xf32>
    %13 = vector.shape_cast %12 : vector<1x2x4xf32> to vector<2x4xf32>
    %14 = vector.shape_cast %10 : vector<2x4xf32> to vector<1x2x4xf32>
    tpu.vector_store %arg7[%11, %c0_6, %c0_7], %14 {strides = array<i32>} : memref<1x2x4xf32, #tpu.memory_space<vmem>>, vector<1x2x4xf32>,
    %c0_i32_8 = arith.constant 0 : i32
    %15 = arith.cmpi eq, %arg0, %c0_i32_8 : i32
    %c1_i32 = arith.constant 1 : i32
    %16 = arith.cmpi eq, %arg1, %c1_i32 : i32
    %17 = arith.andi %15, %16 : i1
    %18 = arith.extui %17 : i1 to i32
    %c0_i32_9 = arith.constant 0 : i32
    %19 = arith.cmpi ne, %18, %c0_i32_9 : i32
    scf.if %19 {
      %c0_10 = arith.constant 0 : index
      %c0_11 = arith.constant 0 : index
      %c0_12 = arith.constant 0 : index
      %20 = vector.load %arg7[%c0_10, %c0_11, %c0_12] : memref<1x2x4xf32, #tpu.memory_space<vmem>>, vector<1x2x4xf32>
      %21 = vector.shape_cast %20 : vector<1x2x4xf32> to vector<2x4xf32>
      %c0_13 = arith.constant 0 : index
      %c0_14 = arith.constant 0 : index
      %c0_15 = arith.constant 0 : index
      %22 = vector.load %arg3[%c0_13, %c0_14, %c0_15] : memref<1x4x8xf32, #tpu.memory_space<vmem>>, vector<1x4x8xf32>
      %23 = vector.shape_cast %22 : vector<1x4x8xf32> to vector<4x8xf32>
      %cst_16 = arith.constant dense<0.000000e+00> : vector<2x8xf32>
      %24 = tpu.matmul %21, %23, %cst_16 {dimension_numbers = #tpu.dot_dimension_numbers<[1], [0], [0], [1], [0, 0, 1, 1], [], []>} : vector<2x4xf32>, vector<4x8xf32>, vector<2x8xf32> -> vector<2x8xf32>
      %cst_17 = arith.constant dense<0.000000e+00> : vector<8xf32>
      %25 = vector.multi_reduction <add>, %24, %cst_17 [0] : vector<2x8xf32> to vector<8xf32>
      %26 = vector.shape_cast %25 : vector<8xf32> to vector<1x8xf32>
      %cst_18 = arith.constant 2.000000e+00 : f32
      %27 = vector.broadcast %cst_18 : f32 to vector<1x8xf32>
      %28 = arith.divf %26, %27 : vector<1x8xf32>
      %29 = vector.broadcast %28 : vector<1x8xf32> to vector<2x8xf32>
      %30 = arith.subf %24, %29 : vector<2x8xf32>
      %31 = arith.mulf %30, %30 : vector<2x8xf32>
      %cst_19 = arith.constant dense<0.000000e+00> : vector<8xf32>
      %32 = vector.multi_reduction <add>, %31, %cst_19 [0] : vector<2x8xf32> to vector<8xf32>
      %33 = vector.shape_cast %32 : vector<8xf32> to vector<1x8xf32>
      %cst_20 = arith.constant 2.000000e+00 : f32
      %34 = vector.broadcast %cst_20 : f32 to vector<1x8xf32>
      %35 = arith.divf %33, %34 : vector<1x8xf32>
      %36 = vector.broadcast %28 : vector<1x8xf32> to vector<2x8xf32>
      %37 = arith.subf %24, %36 : vector<2x8xf32>
      %cst_21 = arith.constant 9.99999974E-6 : f32
      %38 = vector.broadcast %cst_21 : f32 to vector<1x8xf32>
      %39 = arith.addf %35, %38 : vector<1x8xf32>
      %40 = math.rsqrt %39 : vector<1x8xf32>
      %41 = vector.broadcast %40 : vector<1x8xf32> to vector<2x8xf32>
      %42 = arith.mulf %37, %41 : vector<2x8xf32>
      %c0_22 = arith.constant 0 : index
      %c0_23 = arith.constant 0 : index
      %43 = vector.load %arg4[%c0_22, %c0_23] : memref<1x8xf32, #tpu.memory_space<vmem>>, vector<1x8xf32>
      %44 = vector.broadcast %43 : vector<1x8xf32> to vector<2x8xf32>
      %45 = arith.mulf %42, %44 : vector<2x8xf32>
      %c0_24 = arith.constant 0 : index
      %c0_25 = arith.constant 0 : index
      %46 = vector.load %arg5[%c0_24, %c0_25] : memref<1x8xf32, #tpu.memory_space<vmem>>, vector<1x8xf32>
      %47 = vector.broadcast %46 : vector<1x8xf32> to vector<2x8xf32>
      %48 = arith.addf %45, %47 : vector<2x8xf32>
      %49 = vector.shape_cast %48 : vector<2x8xf32> to vector<2x8x1xf32>
      %c0_26 = arith.constant 0 : index
      %c0_27 = arith.constant 0 : index
      %c0_28 = arith.constant 0 : index
      %50 = vector.load %arg6[%c0_26, %c0_27, %c0_28] : memref<2x8x1xf32, #tpu.memory_space<vmem>>, vector<2x8x1xf32>
      tpu.vector_store %arg6[%c0_26, %c0_27, %c0_28], %49 {strides = array<i32>} : memref<2x8x1xf32, #tpu.memory_space<vmem>>, vector<2x8x1xf32>,
    } else {
    }
    return
  }
  func.func @transform_0(%arg0: i32, %arg1: i32) -> (i32, i32, i32) {
    %c0_i32 = arith.constant 0 : i32
    %c0_i32_0 = arith.constant 0 : i32
    return %c0_i32, %arg0, %arg1 : i32, i32, i32
  }
  func.func @transform_1(%arg0: i32, %arg1: i32) -> (i32, i32, i32) {
    %c0_i32 = arith.constant 0 : i32
    %c0_i32_0 = arith.constant 0 : i32
    %c0_i32_1 = arith.constant 0 : i32
    %c0_i32_2 = arith.constant 0 : i32
    return %c0_i32, %c0_i32_0, %c0_i32_1 : i32, i32, i32
  }
  func.func @transform_2(%arg0: i32, %arg1: i32) -> (i32, i32) {
    %c0_i32 = arith.constant 0 : i32
    %c0_i32_0 = arith.constant 0 : i32
    %c0_i32_1 = arith.constant 0 : i32
    return %c0_i32, %c0_i32_0 : i32, i32
  }
  func.func @transform_3(%arg0: i32, %arg1: i32) -> (i32, i32) {
    %c0_i32 = arith.constant 0 : i32
    %c0_i32_0 = arith.constant 0 : i32
    %c0_i32_1 = arith.constant 0 : i32
    return %c0_i32, %c0_i32_0 : i32, i32
  }
  func.func @transform_4(%arg0: i32, %arg1: i32) -> (i32, i32, i32) {
    %c0_i32 = arith.constant 0 : i32
    %c0_i32_0 = arith.constant 0 : i32
    %c0_i32_1 = arith.constant 0 : i32
    %c0_i32_2 = arith.constant 0 : i32
    return %c0_i32, %c0_i32_0, %c0_i32_1 : i32, i32, i32
  }
}

</mosaic_0001>

<bundles_post_ra>
// kernel: tpu_custom_call.1
= control target key start
LH: loop header
LB: loop body
LE: loop exit
PB: predicated region body
PF: predicated region fallthrough
CT: control target
= control target key end

     0   :  { %9 = vsyncpa [#allocation4], 0  ;;  %s843_s0 = inlined_call_operand.hbm [shape: f32[2,4,256], index: 0, kind: input, shape index: {}]   ;;  %s844_s1 = inlined_call_operand.hbm [shape: f32[1,4,8], index: 1, kind: input, shape index: {}]   ;;  %s845_s2 = inlined_call_operand.vmem [shape: f32[1,8], index: 2, kind: input, shape index: {}]   ;;  %s846_s3 = inlined_call_operand.vmem [shape: f32[1,8], index: 3, kind: input, shape index: {}]   ;;  %s847_s4 = inlined_call_operand.vmem [shape: f32[2,8,1], index: 4, kind: output, shape index: {}]  }
   0x1   :  { %11 = vsyncpa [#allocation4 + $0x1], 0 }
   0x2   :  { %12 = vsyncpa [#allocation6], 0  ;;  %s714_s15 = smov 0   ;;  %s716_s16 = smov 0  }
   0x3   :  { %s718_s17 = smov 0   ;;  %s720_s18 = smov 0  }
   0x4   :  { %s722_s19 = smov 0   ;;  %s724_s20 = smov 0  }
   0x5 LB: > { %s471_s21 = sadd.s32 4294967295, %s679_s20   ;;  %s39_s22 = sadd.s32 1, %s667_s17  ;;  %s679_s20 = sphi %s724_s20, %s18_s20   ;;  %s675_s19 = sphi %s722_s19, %s860_s19   ;;  %s671_s18 = sphi %s720_s18, %s859_s18   ;;  %s667_s17 = sphi %s718_s17, %s858_s17   ;;  %s663_s16 = sphi %s716_s16, %s857_s16   ;;  %s659_s15 = sphi %s714_s15, %s856_s15  }
   0x6   : > { %p46_p0 = scmp.ne.s32.totalorder %s667_s17, %s663_s16  ;;  %p47_p1 = scmp.eq.s32.totalorder %s679_s20, 0 }
   0x7   : > { %p52_p2 = scmp.ne.s32.totalorder %s663_s16, %s659_s15  ;;  %p748_p3 = scmp.eq.s32.totalorder %s471_s21, 0 }
   0x8   : > { %p48_p4 = por %p47_p1, %p46_p0  ;;  %p472_p5 = scmp.ge.s32.totalorder %s679_s20, 1 }
   0x9   : > { %p755_p6 = por %p748_p3, %p52_p2  ;;  %p147_p7 = scmp.lt.s32.totalorder %s679_s20, 3 }
   0xa   : > { %s681_s26 = smov [#allocation5]   ;;  %p512_p10 = scmp.lt.s32.totalorder %s679_s20, 2 }
   0xb   : > { %s851_s24 = scalar_select %p755_p6, 1, 0 }
   0xc   : > { %p760_p8 = pnand %p472_p5, %p147_p7  ;;  %s160_s27 = sshll.u32 %s681_s26, 4  ;;  %s161_s27 = int_to_ptr.vmem [resolvable:$true] %s160_s27 }
   0xd   : > { %s177_s28 = sand.u32 1, %s667_s17   ;;  %p770_p12 = pnand %p512_p10, %p48_p4 }
   0xe   : > { %s852_s25 = scalar_select %p760_p8, 1, 0 }
   0xf   : > { %p503_p9 = pneg %p760_p8  ;;  %s582_s30 = scalar_lea.vmem %s161_s27, 64 }
  0x10   : > { %p583_p0 = scmp.ne.s32.totalorder %s161_s27, %s582_s30  ;;  %p590_p5 = scmp.lt.s32.totalorder %s161_s27, %s161_s27 }
  0x11   : > { %p504_p11 = pnand %p503_p9, %p748_p3  ;;  %p591_p7 = scmp.lt.s32.totalorder %s582_s30, %s582_s30 }
  0x13   : > { %p573_p13 = pneg %p504_p11  ;;  %p592_p6 = por %p591_p7, %p590_p5 }
  0x15   : > { %p585_p1 = pnand %p583_p0, %p573_p13 }
  0x17   : > { %p586_p2 = pneg %p585_p1 }
  0x19   : > { %p593_p8 = pnand %p592_p6, %p586_p2 }
  0x1b   : > { %596 = shalt.err (!%p593_p8)
}
  0x1c   : > { %506 = dma.hbm_to_vmem [thread:$0]  (!%p504_p11), %s844_s1, 64, %s161_s27, [#allocation6]  }
  0x1d   : > { %s27_s7 = sadd.s32 1, %s675_s19  ;;  %s475_s8 = sshll.u32 %s177_s28, 3 }
  0x1e   : > { %p28_p4 = scmp.ge.s32.totalorder %s27_s7, 2  ;;  %s476_s9 = sshll.u32 %s675_s19, 6 }
  0x1f   : > { %s181_s10 = scalar_lea.vmem [#allocation3], %s475_s8  ;;  %s188_s14 = scalar_lea.hbm %s843_s0, %s476_s9 }
  0x20   : > { %s189_s11 = sshll.u32 %s181_s10, 4  ;;  %s862_s7 = smov (%p28_p4, %s27_s7), 0  ;;  %s190_s11 = int_to_ptr.vmem [resolvable:$true] %s189_s11 }
  0x21   : > { %s35_s15 = ssub.s32 %s675_s19, %s862_s7  ;;  %s178_s26 = scalar_lea.sflag [#allocation4], %s177_s28 }
  0x22   : > { %p37_p6 = scmp.eq.s32.totalorder %s35_s15, 0  ;;  %p599_p8 = pneg %p770_p12 }
  0x23   : > { %s610_s27 = scalar_lea.vmem %s190_s11, 128  ;;  %s682_s30 = smov [#allocation3]  }
  0x24   : > { %s789_s21 = scalar_select %p37_p6, %s667_s17, %s39_s22  }
  0x25   : > { %p611_p9 = scmp.ne.s32.totalorder %s190_s11, %s610_s27  ;;  %s615_s5 = sshll.u32 %s682_s30, 4  ;;  %s616_s5 = int_to_ptr.vmem [resolvable:$false] %s615_s5 }
  0x26   : > { %s617_s6 = scalar_lea.vmem %s616_s5, 256  ;;  %p618_p13 = scmp.lt.s32.totalorder %s190_s11, %s616_s5 }
  0x27   : > { %p613_p10 = pnand %p611_p9, %p599_p8  ;;  %p619_p0 = scmp.lt.s32.totalorder %s617_s6, %s610_s27 }
  0x29   : > { %p614_p11 = pneg %p613_p10  ;;  %p620_p1 = por %p619_p0, %p618_p13 }
  0x2b   : > { %p621_p2 = pnand %p620_p1, %p614_p11 }
  0x2d   : > { %624 = shalt.err (!%p621_p2)
}
  0x2e   : > { %s683_s8 = smov 128   ;;  %s684_s22 = smov 64  }
  0x2f   : > { %s685_s9 = smov 4   ;;  %p854_p5 = scmp.ne.s32.totalorder %s852_s25, 0 }
  0x30   : > { %510 = dma.hbm_to_vmem [thread:$0]  (!%p770_p12), %s188_s14, 128, %s190_s11, %s178_s26, %s683_s8, %s684_s22, %s685_s9  }
  0x31   : > { %201 = sbr.rel (%p854_p5) target bundleno = 592 (0x250), region = 36  ;;  %s203_s28 = sand.u32 (!%p854_p5), 1, %s663_s16  }
  0x32   : > { %s478_s10 = sshll.u32 (!%p854_p5), %s203_s28, 3  ;;  %s204_s12 = scalar_lea.sflag (!%p854_p5), [#allocation4], %s203_s28 }
  0x33   : > { %s207_s13 = scalar_lea.vmem (!%p854_p5), [#allocation3], %s478_s10  ;;  %p855_p7 = scmp.ne.s32.totalorder (!%p854_p5), %s851_s24, 0 }
  0x36   : > { %650 = dma.done.wait (%p855_p7), %s204_s12, 128  }
  0x37   : > { %652 = vsyncadd (%p855_p7), %s204_s12, 4294967168 }
  0x38   : > { %654 = dma.done.wait (%p748_p3), [#allocation6], 64  }
  0x39   : > { %656 = vsyncadd (%p748_p3), [#allocation6], 4294967232  ;;  %p232_p12 = scmp.eq.s32.totalorder %s671_s18, 0 }
  0x3a   : > { %vm237_vm0 = vcmask (%p232_p12), 25600   ;;  %v686_v0 = vmov (%p232_p12), 0.0  }
  0x3b   : > { %236 = sbr.rel (!%p232_p12) target bundleno = 64 (0x40), region = 48  ;;  %238 = vst.msk [vmem:[#allocation2] sm:$0x3] (%p232_p12), %vm237_vm0, %v686_v0 }
  0x40 PF: > { %v239_v1 = vld [vmem:[%s207_s13] sm:$0xf]  ;;  %vm244_vm1 = vcmask 1043456   ;;  %v240_v2 = vld [vmem:[%s207_s13 + $0x4] sm:$0xf]  ;;  %p269_p4 = scmp.eq.s32.totalorder %s671_s18, 1  ;;  %v253_v5 = vlaneseq }
  0x41   : > { %v245_v3 = vsel %vm244_vm1, %v239_v1, 0.0  ;;  %v248_v4 = vsel %vm244_vm1, %v240_v2, 0.0  ;;  %vm263_vm2 = vcmask 1041409   ;;  %vm267_vm3 = vcmask 25600   ;;  %v275_v16 = vld [vmem:[#allocation5] sm:$0xf] (%p269_p4) }
  0x42   : > { %246 = vadd.xlane.f32.xlu0 %v245_v3  ;;  %v254_v6 = vand.u32 127, %v253_v5  ;;  %v256_v7 = vshrl.u32 %v253_v5, 7  ;;  %v243_v12 = vld [vmem:[#allocation2] sm:$0x3]  ;;  %v687_v18 = vmov (%p269_p4), 0.0   ;;  %vm688_vm4 = vmmov (%p269_p4), 0  }
  0x43   : > { %492 = vmatprep.subr.mxu0 (%p269_p4), %v687_v18  ;;  %494 = vmatprep.mubr.msk.f32.mxu0 (%p269_p4), %vm688_vm4, %v687_v18  ;;  %vm276_vm5 = vcmask (%p269_p4), 31744   ;;  %vm353_vm6 = vcmask (%p269_p4), 58368   ;;  %v484_v41 = vld [vmem:[%s845_s2] ss:$0 sm:$0xff] (%p269_p4)  ;;  %vm406_vm7 = vcmask (%p269_p4), 7168  }
  0x44   : > { %v257_v9 = vsub.s32 %v254_v6, %v256_v7  ;;  %493 = vmatpush3.msk.msra.mxu0 (%p269_p4), %vm244_vm1, %v275_v16  ;;  %v485_v43 = vld [vmem:[%s846_s3] ss:$0 sm:$0xff] (%p269_p4)  ;;  %v394_v45 = vsub.s32 (%p269_p4), 0, %v256_v7  ;;  %v401_v48 = vsub.s32 (%p269_p4), 1, %v256_v7 }
  0x46   : > { %249 = vadd.xlane.f32.xlu0 %v248_v4 }
  0xcb   : > { %v247_v8 = vpop.xlane.xlu0 %246 }
  0xcc   : > { %v258_v11 = vrot.slane %v247_v8, %v257_v9 }
  0xcf   : > { %v250_v10 = vpop.xlane.xlu0 %249 }
  0xd0   : > { %v262_v13 = vrot.slane %v250_v10, %v257_v9 }
  0xd1   : > { %273 = sbr.rel (!%p269_p4) target bundleno = 592 (0x250), region = 52 }
  0xd2   : > { %v264_v14 = vsel %vm263_vm2, %v262_v13, %v258_v11 }
  0xd3   : > { %v266_v15 = vadd.f32 %v264_v14, %v243_v12 }
  0xd5   : > { %268 = vst.msk [vmem:[#allocation2] sm:$0x3] %vm267_vm3, %v266_v15 }
  0xdc   : > { %v274_v17 = vld [vmem:[#allocation2] sm:$0x3] }
  0xdd   : > { %495 = vmatmul.mubr.msk.f32.vlgmr.msra.gmra.mxu0 %vm276_vm5, %v274_v17 }
 0x19d   : > { %v349_v19 = vpop.f32.mrf.mxu0 }
 0x19e   : > { %v354_v20 = vsel %vm353_vm6, %v349_v19, 0.0 }
 0x19f   : > { %v355_v21 = vrot.slane %v354_v20, 4  ;;  %v496_v22 = vpop.f32.mrf.mxu0 }
 0x1a1   : > { %v356_v23 = vadd.f32 %v355_v21, %v354_v20 }
 0x1a3   : > { %v357_v24 = vrot.slane %v356_v23, 2 }
 0x1a5   : > { %v358_v25 = vadd.f32 %v357_v24, %v356_v23 }
 0x1a7   : > { %v359_v26 = vrot.slane %v358_v25, 1 }
 0x1a9   : > { %v360_v27 = vadd.f32 %v359_v26, %v358_v25 }
 0x1ab   : > { %v362_v28 = vmul.f32 0.5, %v360_v27 }
 0x1ad   : > { %v363_v29 = vsub.f32 %v349_v19, %v362_v28 }
 0x1af   : > { %v364_v30 = vmul.f32 %v363_v29, %v363_v29 }
 0x1b1   : > { %v365_v31 = vsel %vm353_vm6, %v364_v30, 0.0 }
 0x1b2   : > { %v366_v32 = vrot.slane %v365_v31, 4 }
 0x1b4   : > { %v367_v33 = vadd.f32 %v366_v32, %v365_v31 }
 0x1b6   : > { %v368_v34 = vrot.slane %v367_v33, 2 }
 0x1b8   : > { %v369_v35 = vadd.f32 %v368_v34, %v367_v33 }
 0x1ba   : > { %v370_v36 = vrot.slane %v369_v35, 1 }
 0x1bc   : > { %v371_v37 = vadd.f32 %v370_v36, %v369_v35 }
 0x1be   : > { %v372_v38 = vmul.f32 0.5, %v371_v37 }
 0x1c0   : > { %v373_v39 = vadd.f32 1e-05, %v372_v38 }
 0x1c2   : > { %569 = vrsqrt.f32 %v373_v39 }
 0x1cf   : > { %v570_v40 = vpop.eup %569 }
 0x1d0   : > { %v375_v42 = vmul.f32 %v570_v40, %v363_v29 }
 0x1d2   : > { %v383_v44 = vmul.f32 %v484_v41, %v375_v42 }
 0x1d4   : > { %v391_v46 = vadd.f32 %v485_v43, %v383_v44 }
 0x1d6   : > { %v395_v47 = vrot.slane %v391_v46, %v394_v45  ;;  %v402_v49 = vrot.slane %v391_v46, %v401_v48 }
 0x1d8   : > { %397 = vbcast.lane.b32.xlu0 %v395_v47, 256 }
 0x1dc   : > { %404 = vbcast.lane.b32.xlu0 %v402_v49, 256 }
 0x24a   : > { %v398_v50 = vpop.permute.xlu0 %397 }
 0x24b   : > { %407 = vst.msk [vmem:[%s847_s4] sm:$0xff] %vm406_vm7, %v398_v50 }
 0x24e   : > { %v405_v51 = vpop.permute.xlu0 %404 }
 0x24f   : > { %408 = vst.msk [vmem:[%s847_s4 + $0x8] sm:$0xff] %vm406_vm7, %v405_v51 }
 0x250 PF: > { %s18_s20 = sadd.s32 1, %s679_s20   ;;  %s856_s15 = smov %s663_s16 }
 0x251   : > { %p15_p3 = scmp.ge.s32.totalorder %s18_s20, 4   ;;  %s857_s16 = smov %s667_s17 }
 0x252   : > { %s858_s17 = smov %s789_s21  ;;  %s859_s18 = smov %s675_s19 }
 0x253   : > { %s860_s19 = smov %s862_s7  ;;  %17 = sbr.rel (!%p15_p3) target bundleno = 5 (0x5), region = 85 }
 0x258   :  { %420 = vsyncpa [#allocation4], 1 }
 0x259   :  { %422 = vsyncpa [#allocation4 + $0x1], 1 }
 0x25a   :  { %423 = vsyncpa [#allocation6], 1 }

</bundles_post_ra>
